<compile_context>
chip_gen: v6e
topology: v6e:2x2x1
jax: 0.10.0
libtpu: 0.0.40
codegen_flags: <defaults>
</compile_context>

<pallas_src>
import functools

import jax
import jax.numpy as jnp
from jax.experimental import pallas as pl
from jax.experimental.pallas import tpu as pltpu


# Packed-slab row layout (all region offsets are multiples of 16 -> aligned to
# the bf16 (16, 128) sublane/lane tile).
_W1_OFF = 0      # rows [  0,  16): fused layer-1 weight (rows 0..7 used, 8..15 zero)
_W2_OFF = 16     # rows [ 16, 144): block-diagonal layer-2 weight (128, 128)
_W3_OFF = 144    # rows [144, 272): block-diagonal layer-3 weight (128, 128)
_W4_OFF = 272    # rows [272, 400): fused head weight, lanes 0..5 used
_B_OFF = 400     # rows [400, 416): biases b1..b4 in rows 0..3, rest zero
_SLAB_ROWS = 416

_IN_LANES = 16   # layer-1 contraction dim (8 real features + 8 zero pad)
_OUT_LANES = 8   # packed output: col 0 = critic value, cols 1..5 = actor logits


def _ac_fused_kernel(x_ref, w_ref, o_ref, *, batch, fuse_softmax):
    f32 = jnp.float32
    x = x_ref[...]                                        # (TB, 16) bf16

    w1 = w_ref[_W1_OFF:_W1_OFF + _IN_LANES, :]            # (16, 128) bf16
    w2 = w_ref[_W2_OFF:_W2_OFF + 128, :]                  # (128, 128) block-diag
    w3 = w_ref[_W3_OFF:_W3_OFF + 128, :]                  # (128, 128) block-diag
    w4 = w_ref[_W4_OFF:_W4_OFF + 128, 0:_OUT_LANES]       # (128, 8) fused heads
    # Bias rows read directly (no staged (8,128) bias tile).
    b1 = w_ref[pl.ds(_B_OFF + 0, 1), :].astype(f32)       # (1, 128)
    b2 = w_ref[pl.ds(_B_OFF + 1, 1), :].astype(f32)
    b3 = w_ref[pl.ds(_B_OFF + 2, 1), :].astype(f32)
    b4 = w_ref[pl.ds(_B_OFF + 3, 1), 0:_OUT_LANES].astype(f32)   # (1, 8)

    def dense_relu(h, w, b):
        z = jnp.dot(h, w, preferred_element_type=f32) + b
        return jnp.maximum(z, 0.0).astype(jnp.bfloat16)

    h = dense_relu(x, w1, b1)
    h = dense_relu(h, w2, b2)
    h = dense_relu(h, w3, b3)
    out = jnp.dot(h, w4, preferred_element_type=f32) + b4  # (TB, 8) f32

    if fuse_softmax:
        # Whole batch lives in this single tile: apply softmax over the batch
        # axis (dim=0) to the actor-logit lanes, masking padded rows to -inf
        # so they cannot contaminate the max/sum.  Column 0 (value) and the
        # dead lanes 6..7 keep the raw head output.
        tb = out.shape[0]
        row = jax.lax.broadcasted_iota(jnp.int32, (tb, _OUT_LANES), 0)
        col = jax.lax.broadcasted_iota(jnp.int32, (tb, _OUT_LANES), 1)
        masked = jnp.where(row < batch, out, -jnp.inf)
        m = jnp.max(masked, axis=0, keepdims=True)
        e = jnp.exp(masked - m)
        s = jnp.sum(e, axis=0, keepdims=True)
        probs = e / s
        is_logit = jnp.logical_and(col >= 1, col <= 5)
        out = jnp.where(is_logit, probs, out)

    o_ref[...] = out.astype(o_ref.dtype)


def _round_up(n, m):
    return ((n + m - 1) // m) * m


def actor_critic_forward(x, slab, *, single_tile_max=2048):
    """x: (B, 8) float; slab: packed (416, 128) bf16 parameter slab.

    Returns (val (B,1), pol (B,5)) matching the PyTorch module, including
    softmax over dim=0 (the batch axis) on the actor head."""
    B = x.shape[0]
    fuse = B <= single_tile_max
    if fuse:
        TB = _round_up(max(B, 1), 16)
        Bp = TB
    else:
        n_tiles = max(2, -(-B // single_tile_max))        # ceil; >=2 tiles (v7x megacore)
        TB = min(single_tile_max, _round_up(-(-B // n_tiles), 16))
        Bp = _round_up(B, TB)

    # Pad batch to the tile size and features 8 -> 16 (zero input lanes x zero
    # weight rows keep the layer-1 matmul exact); cast operands to bf16.
    x = jnp.pad(x.astype(jnp.bfloat16),
                ((0, Bp - B), (0, _IN_LANES - x.shape[1])))

    kernel = functools.partial(_ac_fused_kernel, batch=B, fuse_softmax=fuse)

    packed = pl.pallas_call(
        kernel,
        out_shape=jax.ShapeDtypeStruct((Bp, _OUT_LANES), jnp.float32),
        grid_spec=pltpu.PrefetchScalarGridSpec(
            num_scalar_prefetch=0,
            grid=(Bp // TB,),
            in_specs=[
                pl.BlockSpec((TB, _IN_LANES), lambda i: (i, 0)),      # batch tile of x
                # Resident weight slab (constant block index).  Could be
                # single-buffered via pipeline_mode=pl.Buffered(1); kept at the
                # default double buffer (~100 KB) for maximum compatibility.
                pl.BlockSpec((_SLAB_ROWS, 128), lambda i: (0, 0)),
            ],
            out_specs=pl.BlockSpec((TB, _OUT_LANES), lambda i: (i, 0)),
        ),
        compiler_params=pltpu.CompilerParams(
            dimension_semantics=("parallel",),     # shard batch tiles across TCs
            vmem_limit_bytes=32 * 1024 * 1024,     # lift v5e's 16 MiB scoped default
        ),
    )(x, slab)

    val = packed[:B, 0:1]
    if fuse:
        pol = packed[:B, 1:6]                      # softmax already applied in-kernel
    else:
        # Batch was split across grid tiles -> normalize over the full batch here.
        pol = jax.nn.softmax(packed[:B, 1:6], axis=0)
    return val, pol


_LAYER_DIMS = {
    "1c": (8, 64), "2c": (64, 64), "3c": (64, 64), "4c": (64, 1),
    "1a": (8, 64), "2a": (64, 64), "3a": (64, 64), "4a": (64, 5),
}


def init_params(key):
    """nn.Linear-style init (uniform +/- 1/sqrt(fan_in)).

    Weights stored pre-transposed as (in, out); biases as (out,)."""
    params = {}
    keys = jax.random.split(key, 2 * len(_LAYER_DIMS))
    for i, (name, (fan_in, fan_out)) in enumerate(_LAYER_DIMS.items()):
        bound = 1.0 / (float(fan_in) ** 0.5)
        params[f"w{name}"] = jax.random.uniform(
            keys[2 * i], (fan_in, fan_out), jnp.float32, -bound, bound)
        params[f"b{name}"] = jax.random.uniform(
            keys[2 * i + 1], (fan_out,), jnp.float32, -bound, bound)
    return params


def pack_params(params, dtype=jnp.bfloat16):
    """Pack all weights/biases into one (416, 128) slab (block-diagonal fusion)."""
    slab = jnp.zeros((_SLAB_ROWS, 128), jnp.float32)
    # Layer 1: critic -> lanes 0..63, actor -> lanes 64..127 (rows 8..15 stay zero).
    slab = slab.at[_W1_OFF:_W1_OFF + 8, 0:64].set(params["w1c"])
    slab = slab.at[_W1_OFF:_W1_OFF + 8, 64:128].set(params["w1a"])
    # Layers 2 and 3: block-diagonal (critic top-left, actor bottom-right).
    slab = slab.at[_W2_OFF:_W2_OFF + 64, 0:64].set(params["w2c"])
    slab = slab.at[_W2_OFF + 64:_W2_OFF + 128, 64:128].set(params["w2a"])
    slab = slab.at[_W3_OFF:_W3_OFF + 64, 0:64].set(params["w3c"])
    slab = slab.at[_W3_OFF + 64:_W3_OFF + 128, 64:128].set(params["w3a"])
    # Layer 4 heads, narrowed to lanes 0..7: value -> lane 0, logits -> lanes 1..5.
    slab = slab.at[_W4_OFF:_W4_OFF + 64, 0:1].set(params["w4c"])
    slab = slab.at[_W4_OFF + 64:_W4_OFF + 128, 1:6].set(params["w4a"])
    # Biases (rows _B_OFF .. _B_OFF+3).
    slab = slab.at[_B_OFF + 0, 0:64].set(params["b1c"])
    slab = slab.at[_B_OFF + 0, 64:128].set(params["b1a"])
    slab = slab.at[_B_OFF + 1, 0:64].set(params["b2c"])
    slab = slab.at[_B_OFF + 1, 64:128].set(params["b2a"])
    slab = slab.at[_B_OFF + 2, 0:64].set(params["b3c"])
    slab = slab.at[_B_OFF + 2, 64:128].set(params["b3a"])
    slab = slab.at[_B_OFF + 3, 0:1].set(params["b4c"])
    slab = slab.at[_B_OFF + 3, 1:6].set(params["b4a"])
    return slab.astype(dtype)


def reference_forward(x, params):
    """Pure-JAX (f32) reference of the PyTorch forward for sanity checking."""
    def d(h, w, b):
        return h @ w + b
    v = jax.nn.relu(d(x, params["w1c"], params["b1c"]))
    v = jax.nn.relu(d(v, params["w2c"], params["b2c"]))
    v = jax.nn.relu(d(v, params["w3c"], params["b3c"]))
    v = d(v, params["w4c"], params["b4c"])
    p = jax.nn.relu(d(x, params["w1a"], params["b1a"]))
    p = jax.nn.relu(d(p, params["w2a"], params["b2a"]))
    p = jax.nn.relu(d(p, params["w3a"], params["b3a"]))
    logits = d(p, params["w4a"], params["b4a"])
    pol = jax.nn.softmax(logits, axis=0)  # dim=0, as in the torch module
    return v, pol


if __name__ == "__main__":
    key = jax.random.PRNGKey(0)
    k_param, k_x = jax.random.split(key)
    params = init_params(k_param)
    slab = pack_params(params)

    # --- small batch: single-tile path with in-kernel batch-axis softmax ---
    B = 8  # small batch of 8-dim states (RL swarm states)
    x = jax.random.normal(k_x, (B, 8), dtype=jnp.float32)
    val, pol = actor_critic_forward(x, slab)
    jax.block_until_ready((val, pol))

    val_ref, pol_ref = reference_forward(x, params)
    assert val.shape == (B, 1) and pol.shape == (B, 5)
    # bf16 operands (f32 accumulation) -> tolerances loosened vs the f32 version.
    assert jnp.allclose(val, val_ref, atol=3e-2, rtol=3e-2)
    assert jnp.allclose(pol, pol_ref, atol=2e-2, rtol=0.0)
    assert jnp.allclose(jnp.sum(pol, axis=0), 1.0, atol=1e-3)

    # --- larger batch forced down the multi-tile ("parallel" grid) path ---
    B2 = 48
    x2 = jax.random.normal(jax.random.PRNGKey(1), (B2, 8), dtype=jnp.float32)
    val2, pol2 = actor_critic_forward(x2, slab, single_tile_max=16)
    jax.block_until_ready((val2, pol2))
    val2_ref, pol2_ref = reference_forward(x2, params)
    assert val2.shape == (B2, 1) and pol2.shape == (B2, 5)
    assert jnp.allclose(val2, val2_ref, atol=3e-2, rtol=3e-2)
    assert jnp.allclose(pol2, pol2_ref, atol=2e-2, rtol=0.0)
    assert jnp.allclose(jnp.sum(pol2, axis=0), 1.0, atol=1e-3)

    print("KERNEL_OK")
</pallas_src>

<mosaic_0001>
module attributes {stable_mosaic.version = 11 : i64} {
  func.func @_ac_fused_kernel(%arg0: i32, %arg1: memref<16x16xbf16, #tpu.memory_space<vmem>>, %arg2: memref<416x128xbf16, #tpu.memory_space<vmem>>, %arg3: memref<16x8xf32, #tpu.memory_space<vmem>>) attributes {dimension_semantics = [#tpu.dimension_semantics<parallel>], iteration_bounds = array<i64: 1>, scalar_prefetch = 0 : i64, scratch_operands = 0 : i64, tpu.core_type = #tpu.core_type<tc>, window_params = [{transform_indices = @transform_0, window_bounds = array<i64: 16, 16>}, {pipeline_mode = #tpu.pipeline_mode<synchronous>, transform_indices = @transform_1, window_bounds = array<i64: 416, 128>}, {transform_indices = @transform_2, window_bounds = array<i64: 16, 8>}]} {
    %c0 = arith.constant 0 : index
    %c0_0 = arith.constant 0 : index
    %0 = vector.load %arg1[%c0, %c0_0] : memref<16x16xbf16, #tpu.memory_space<vmem>>, vector<16x16xbf16>
    %c0_1 = arith.constant 0 : index
    %c0_2 = arith.constant 0 : index
    %1 = vector.load %arg2[%c0_1, %c0_2] : memref<416x128xbf16, #tpu.memory_space<vmem>>, vector<16x128xbf16>
    %c16 = arith.constant 16 : index
    %c0_3 = arith.constant 0 : index
    %2 = vector.load %arg2[%c16, %c0_3] : memref<416x128xbf16, #tpu.memory_space<vmem>>, vector<128x128xbf16>
    %c144 = arith.constant 144 : index
    %c0_4 = arith.constant 0 : index
    %3 = vector.load %arg2[%c144, %c0_4] : memref<416x128xbf16, #tpu.memory_space<vmem>>, vector<128x128xbf16>
    %c272 = arith.constant 272 : index
    %c0_5 = arith.constant 0 : index
    %4 = vector.load %arg2[%c272, %c0_5] : memref<416x128xbf16, #tpu.memory_space<vmem>>, vector<128x8xbf16>
    %c400 = arith.constant 400 : index
    %c0_6 = arith.constant 0 : index
    %5 = vector.load %arg2[%c400, %c0_6] : memref<416x128xbf16, #tpu.memory_space<vmem>>, vector<1x128xbf16>
    %6 = arith.extf %5 : vector<1x128xbf16> to vector<1x128xf32>
    %c401 = arith.constant 401 : index
    %c0_7 = arith.constant 0 : index
    %7 = vector.load %arg2[%c401, %c0_7] : memref<416x128xbf16, #tpu.memory_space<vmem>>, vector<1x128xbf16>
    %8 = arith.extf %7 : vector<1x128xbf16> to vector<1x128xf32>
    %c402 = arith.constant 402 : index
    %c0_8 = arith.constant 0 : index
    %9 = vector.load %arg2[%c402, %c0_8] : memref<416x128xbf16, #tpu.memory_space<vmem>>, vector<1x128xbf16>
    %10 = arith.extf %9 : vector<1x128xbf16> to vector<1x128xf32>
    %c403 = arith.constant 403 : index
    %c0_9 = arith.constant 0 : index
    %11 = vector.load %arg2[%c403, %c0_9] : memref<416x128xbf16, #tpu.memory_space<vmem>>, vector<1x8xbf16>
    %12 = arith.extf %11 : vector<1x8xbf16> to vector<1x8xf32>
    %cst = arith.constant dense<0.000000e+00> : vector<16x128xf32>
    %13 = tpu.matmul %0, %1, %cst {dimension_numbers = #tpu.dot_dimension_numbers<[1], [0], [0], [1], [0, 0, 1, 1], [], []>} : vector<16x16xbf16>, vector<16x128xbf16>, vector<16x128xf32> -> vector<16x128xf32>
    %14 = vector.broadcast %6 : vector<1x128xf32> to vector<16x128xf32>
    %15 = arith.addf %13, %14 : vector<16x128xf32>
    %cst_10 = arith.constant 0.000000e+00 : f32
    %16 = vector.broadcast %cst_10 : f32 to vector<16x128xf32>
    %17 = arith.maximumf %15, %16 : vector<16x128xf32>
    %18 = arith.truncf %17 : vector<16x128xf32> to vector<16x128xbf16>
    %cst_11 = arith.constant dense<0.000000e+00> : vector<16x128xf32>
    %19 = tpu.matmul %18, %2, %cst_11 {dimension_numbers = #tpu.dot_dimension_numbers<[1], [0], [0], [1], [0, 0, 1, 1], [], []>} : vector<16x128xbf16>, vector<128x128xbf16>, vector<16x128xf32> -> vector<16x128xf32>
    %20 = vector.broadcast %8 : vector<1x128xf32> to vector<16x128xf32>
    %21 = arith.addf %19, %20 : vector<16x128xf32>
    %cst_12 = arith.constant 0.000000e+00 : f32
    %22 = vector.broadcast %cst_12 : f32 to vector<16x128xf32>
    %23 = arith.maximumf %21, %22 : vector<16x128xf32>
    %24 = arith.truncf %23 : vector<16x128xf32> to vector<16x128xbf16>
    %cst_13 = arith.constant dense<0.000000e+00> : vector<16x128xf32>
    %25 = tpu.matmul %24, %3, %cst_13 {dimension_numbers = #tpu.dot_dimension_numbers<[1], [0], [0], [1], [0, 0, 1, 1], [], []>} : vector<16x128xbf16>, vector<128x128xbf16>, vector<16x128xf32> -> vector<16x128xf32>
    %26 = vector.broadcast %10 : vector<1x128xf32> to vector<16x128xf32>
    %27 = arith.addf %25, %26 : vector<16x128xf32>
    %cst_14 = arith.constant 0.000000e+00 : f32
    %28 = vector.broadcast %cst_14 : f32 to vector<16x128xf32>
    %29 = arith.maximumf %27, %28 : vector<16x128xf32>
    %30 = arith.truncf %29 : vector<16x128xf32> to vector<16x128xbf16>
    %cst_15 = arith.constant dense<0.000000e+00> : vector<16x8xf32>
    %31 = tpu.matmul %30, %4, %cst_15 {dimension_numbers = #tpu.dot_dimension_numbers<[1], [0], [0], [1], [0, 0, 1, 1], [], []>} : vector<16x128xbf16>, vector<128x8xbf16>, vector<16x8xf32> -> vector<16x8xf32>
    %32 = vector.broadcast %12 : vector<1x8xf32> to vector<16x8xf32>
    %33 = arith.addf %31, %32 : vector<16x8xf32>
    %34 = tpu.iota {dimensions = array<i32: 0>} : vector<16x8xi32>
    %35 = tpu.iota {dimensions = array<i32: 1>} : vector<16x8xi32>
    %c8_i32 = arith.constant 8 : i32
    %36 = vector.broadcast %c8_i32 : i32 to vector<16x8xi32>
    %37 = arith.cmpi slt, %34, %36 : vector<16x8xi32>
    %cst_16 = arith.constant 0xFF800000 : f32
    %38 = vector.broadcast %cst_16 : f32 to vector<16x8xf32>
    %39 = arith.select %37, %33, %38 : vector<16x8xi1>, vector<16x8xf32>
    %cst_17 = arith.constant dense<0xFF800000> : vector<8xf32>
    %40 = vector.multi_reduction <maximumf>, %39, %cst_17 [0] : vector<16x8xf32> to vector<8xf32>
    %41 = vector.shape_cast %40 : vector<8xf32> to vector<1x8xf32>
    %42 = vector.broadcast %41 : vector<1x8xf32> to vector<16x8xf32>
    %43 = arith.subf %39, %42 : vector<16x8xf32>
    %44 = math.exp %43 : vector<16x8xf32>
    %cst_18 = arith.constant dense<0.000000e+00> : vector<8xf32>
    %45 = vector.multi_reduction <add>, %44, %cst_18 [0] : vector<16x8xf32> to vector<8xf32>
    %46 = vector.shape_cast %45 : vector<8xf32> to vector<1x8xf32>
    %47 = vector.broadcast %46 : vector<1x8xf32> to vector<16x8xf32>
    %48 = arith.divf %44, %47 : vector<16x8xf32>
    %c1_i32 = arith.constant 1 : i32
    %49 = vector.broadcast %c1_i32 : i32 to vector<16x8xi32>
    %50 = arith.cmpi sge, %35, %49 : vector<16x8xi32>
    %c5_i32 = arith.constant 5 : i32
    %51 = vector.broadcast %c5_i32 : i32 to vector<16x8xi32>
    %52 = arith.cmpi sle, %35, %51 : vector<16x8xi32>
    %53 = arith.andi %50, %52 : vector<16x8xi1>
    %54 = arith.select %53, %48, %33 : vector<16x8xi1>, vector<16x8xf32>
    %c0_19 = arith.constant 0 : index
    %c0_20 = arith.constant 0 : index
    %55 = vector.load %arg3[%c0_19, %c0_20] : memref<16x8xf32, #tpu.memory_space<vmem>>, vector<16x8xf32>
    tpu.vector_store %arg3[%c0_19, %c0_20], %54 {strides = array<i32>} : memref<16x8xf32, #tpu.memory_space<vmem>>, vector<16x8xf32>,
    return
  }
  func.func @transform_0(%arg0: i32) -> (i32, i32) {
    %c0_i32 = arith.constant 0 : i32
    %c0_i32_0 = arith.constant 0 : i32
    return %arg0, %c0_i32 : i32, i32
  }
  func.func @transform_1(%arg0: i32) -> (i32, i32) {
    %c0_i32 = arith.constant 0 : i32
    %c0_i32_0 = arith.constant 0 : i32
    %c0_i32_1 = arith.constant 0 : i32
    return %c0_i32, %c0_i32_0 : i32, i32
  }
  func.func @transform_2(%arg0: i32) -> (i32, i32) {
    %c0_i32 = arith.constant 0 : i32
    %c0_i32_0 = arith.constant 0 : i32
    return %arg0, %c0_i32 : i32, i32
  }
}

</mosaic_0001>

<bundles_post_ra>
// kernel: tpu_custom_call.1
= control target key start
LH: loop header
LB: loop body
LE: loop exit
PB: predicated region body
PF: predicated region fallthrough
CT: control target
= control target key end

     0   :  { %7 = vsyncpa [#allocation3], 0  ;;  %s777_s0 = inlined_call_operand.hbm [shape: bf16[16,16], index: 0, kind: input, shape index: {}]   ;;  %s778_s1 = inlined_call_operand.hbm [shape: bf16[416,128], index: 1, kind: input, shape index: {}]   ;;  %s779_s2 = inlined_call_operand.vmem [shape: f32[16,8], index: 2, kind: output, shape index: {}]  }
   0x1   :  { %8 = vsyncpa [#allocation5], 0  ;;  %s698_s9 = smov [#allocation2]  }
   0x2   :  { %s14_s10 = sshll.u32 %s698_s9, 4  ;;  %s15_s10 = int_to_ptr.vmem [resolvable:$true] %s14_s10 }
   0x3   :  { %s662_s11 = scalar_lea.vmem %s15_s10, 128  ;;  %p667_p1 = scmp.lt.s32.totalorder %s15_s10, %s15_s10 }
   0x4   :  { %p663_p0 = scmp.ne.s32.totalorder %s15_s10, %s662_s11  ;;  %p668_p2 = scmp.lt.s32.totalorder %s662_s11, %s662_s11 }
   0x6   :  { %p669_p3 = por %p668_p2, %p667_p1 }
   0x8   :  { %p670_p4 = pnand %p669_p3, %p663_p0 }
   0xa   :  { %673 = shalt.err (!%p670_p4)
}
   0xb   :  { %s699_s12 = smov 64   ;;  %s700_s13 = smov 4  }
   0xc   :  { %20 = dma.hbm_to_vmem [thread:$0]  %s777_s0, 128, %s15_s10, [#allocation3], %s699_s12, %s699_s12, %s700_s13  }
   0xd   :  { %s701_s16 = smov [#allocation4]  }
   0xe   :  { %s26_s17 = sshll.u32 %s701_s16, 4  ;;  %s27_s17 = int_to_ptr.vmem [resolvable:$true] %s26_s17 }
   0xf   :  { %s682_s18 = scalar_lea.vmem %s27_s17, 3328  ;;  %p687_p6 = scmp.lt.s32.totalorder %s27_s17, %s27_s17 }
  0x10   :  { %p683_p5 = scmp.ne.s32.totalorder %s27_s17, %s682_s18  ;;  %p688_p7 = scmp.lt.s32.totalorder %s682_s18, %s682_s18 }
  0x12   :  { %p689_p8 = por %p688_p7, %p687_p6 }
  0x14   :  { %p690_p9 = pnand %p689_p8, %p683_p5 }
  0x16   :  { %693 = shalt.err (!%p690_p9)
}
  0x17   :  { %32 = dma.hbm_to_vmem [thread:$0]  %s778_s1, 3328, %s27_s17, [#allocation5], %s699_s12, %s699_s12, %s700_s13  }
  0x18   :  { %694 = dma.done.wait [#allocation3], 128  }
  0x19   :  { %695 = vsyncadd [#allocation3], 4294967168 }
  0x1a   :  { %696 = dma.done.wait [#allocation5], 3328  }
  0x1b   :  { %697 = vsyncadd [#allocation5], 4294963968  ;;  %v702_v0 = vmov 0.0   ;;  %vm703_vm0 = vmmov 0   ;;  %v622_v1 = vld [vmem:[#allocation4] sm:$0xff]   ;;  %v623_v2 = vld [vmem:[#allocation2] sm:$0xff]   ;;  %v96_v16 = vlaneseq }
  0x1c   :  { %550 = vmatprep.subr.bf16.mxu0 %v702_v0  ;;  %552 = vmatprep.mubr.msk.bf16.mxu0 %vm703_vm0, %v702_v0  ;;  %vm111_vm1 = vcmask 130048   ;;  %v624_v3 = vld [vmem:[#allocation4 + $0x40] sm:$0xff]   ;;  %v625_v4 = vld [vmem:[#allocation4 + $0x38] sm:$0xff]   ;;  %v626_v5 = vld [vmem:[#allocation4 + $0x30] sm:$0xff]   ;;  %vm453_vm2 = vcmask 64512  }
  0x1d   :  { %556 = vmatprep.subr.bf16.mxu1 %v702_v0  ;;  %572 = vmatprep.mubr.msk.bf16.mxu1 %vm703_vm0, %v702_v0  ;;  %v627_v6 = vld [vmem:[#allocation4 + $0x28] sm:$0xff]   ;;  %v628_v7 = vld [vmem:[#allocation4 + $0x20] sm:$0xff]   ;;  %v629_v8 = vld [vmem:[#allocation4 + $0x18] sm:$0xff]   ;;  %v748_v17 = vshrl.u32 %v96_v16, 7 }
  0x1e   :  { %551 = vmatpush3.bf16.msra.mxu0 %v622_v1  ;;  %557 = vmatpush3.bf16.msra.mxu1 %v624_v3  ;;  %v630_v9 = vld [vmem:[#allocation4 + $0x10] sm:$0xff]   ;;  %v631_v10 = vld [vmem:[#allocation4 + $0x8] sm:$0xff]   ;;  %v632_v11 = vld [vmem:[#allocation4 + $0x80] sm:$0xff]  }
  0x1f   :  { %576 = vmatprep.subr.bf16.mxu0 %v702_v0  ;;  %558 = vmatprep.subr.bf16.mxu1 %v702_v0  ;;  %v633_v12 = vld [vmem:[#allocation4 + $0x78] sm:$0xff]   ;;  %v634_v13 = vld [vmem:[#allocation4 + $0x70] sm:$0xff]   ;;  %v635_v14 = vld [vmem:[#allocation4 + $0x68] sm:$0xff]   ;;  %v98_v20 = vsub.s32 0, %v748_v17  ;;  %v161_v39 = vsub.s32 1, %v748_v17  ;;  %v257_v55 = vsub.s32 2, %v748_v17 }
  0x20   :  { %v636_v15 = vld [vmem:[#allocation4 + $0x60] sm:$0xff]   ;;  %v92_v18 = vld [vmem:[#allocation4 + $0xc8] sm:$0x1]  ;;  %v637_v31 = vld [vmem:[#allocation4 + $0x58] sm:$0xff]   ;;  %v353_v3 = vsub.s32 3, %v748_v17 }
  0x21   :  { %553 = vmatmul.mubr.msk.bf16.vlgmr.msra.gmra.mxu0 %vm111_vm1, %v623_v2  ;;  %v93_v19 = vunpack.c.l.bf16 %v92_v18  ;;  %v638_v32 = vld [vmem:[#allocation4 + $0x50] sm:$0xff]   ;;  %v639_v33 = vld [vmem:[#allocation4 + $0x48] sm:$0xff]   ;;  %v640_v34 = vld [vmem:[#allocation4 + $0xc0] sm:$0xff]  }
  0x22   :  { %592 = vmatprep.mubr.msk.bf16.mxu0 %vm703_vm0, %v702_v0  ;;  %559 = vmatpush3.bf16.msra.mxu1 %v625_v4  ;;  %v641_v35 = vld [vmem:[#allocation4 + $0xb8] sm:$0xff]   ;;  %v642_v36 = vld [vmem:[#allocation4 + $0xb0] sm:$0xff]   ;;  %v643_v37 = vld [vmem:[#allocation4 + $0xa8] sm:$0xff]  }
  0x23   :  { %560 = vmatprep.subr.bf16.mxu1 %v702_v0  ;;  %577 = vmatpush3.bf16.msra.mxu0 %v632_v11  ;;  %v99_v21 = vrot.slane %v93_v19, %v98_v20  ;;  %v644_v38 = vld [vmem:[#allocation4 + $0xa0] sm:$0xff]   ;;  %v162_v40 = vrot.slane %v93_v19, %v161_v39  ;;  %v645_v50 = vld [vmem:[#allocation4 + $0x98] sm:$0xff]   ;;  %v646_v51 = vld [vmem:[#allocation4 + $0x90] sm:$0xff]  }
  0x24   :  { %578 = vmatprep.subr.bf16.mxu0 %v702_v0  ;;  %v647_v52 = vld [vmem:[#allocation4 + $0x88] sm:$0xff]  }
  0x25   :  { %v94_v53 = vld [vmem:[#allocation4 + $0xc8] sm:$0x2] }
  0x26   :  { %561 = vmatpush3.bf16.msra.mxu1 %v626_v5  ;;  %v95_v54 = vunpack.c.l.bf16 %v94_v53 }
  0x27   :  { %562 = vmatprep.subr.bf16.mxu1 %v702_v0  ;;  %579 = vmatpush3.bf16.msra.mxu0 %v633_v12 }
  0x28   :  { %580 = vmatprep.subr.bf16.mxu0 %v702_v0  ;;  %v258_v56 = vrot.slane %v95_v54, %v257_v55 }
  0x2a   :  { %563 = vmatpush3.bf16.msra.mxu1 %v627_v6 }
  0x2b   :  { %564 = vmatprep.subr.bf16.mxu1 %v702_v0  ;;  %581 = vmatpush3.bf16.msra.mxu0 %v634_v13 }
  0x2c   :  { %582 = vmatprep.subr.bf16.mxu0 %v702_v0 }
  0x2e   :  { %565 = vmatpush3.bf16.msra.mxu1 %v628_v7 }
  0x2f   :  { %566 = vmatprep.subr.bf16.mxu1 %v702_v0  ;;  %583 = vmatpush3.bf16.msra.mxu0 %v635_v14 }
  0x30   :  { %584 = vmatprep.subr.bf16.mxu0 %v702_v0 }
  0x32   :  { %567 = vmatpush3.bf16.msra.mxu1 %v629_v8 }
  0x33   :  { %568 = vmatprep.subr.bf16.mxu1 %v702_v0  ;;  %585 = vmatpush3.bf16.msra.mxu0 %v636_v15 }
  0x34   :  { %586 = vmatprep.subr.bf16.mxu0 %v702_v0 }
  0x36   :  { %569 = vmatpush3.bf16.msra.mxu1 %v630_v9 }
  0x37   :  { %570 = vmatprep.subr.bf16.mxu1 %v702_v0  ;;  %587 = vmatpush3.bf16.msra.mxu0 %v637_v31 }
  0x38   :  { %588 = vmatprep.subr.bf16.mxu0 %v702_v0 }
  0x3a   :  { %571 = vmatpush3.bf16.msra.mxu1 %v631_v10 }
  0x3b   :  { %596 = vmatprep.subr.bf16.mxu1 %v702_v0  ;;  %589 = vmatpush3.bf16.msra.mxu0 %v638_v32  ;;  %v448_v32 = vand.u32 127, %v96_v16 }
  0x3c   :  { %590 = vmatprep.subr.bf16.mxu0 %v702_v0 }
  0x3d   :  { %vm481_vm3 = vcmp.ge.s32.totalorder %v448_v32, 1  ;;  %vm482_vm4 = vcmp.le.s32.totalorder %v448_v32, 5 }
  0x3e   :  { %vm483_vm5 = vmand %vm481_vm3, %vm482_vm4 }
  0x3f   :  { %591 = vmatpush3.bf16.msra.mxu0 %v639_v33 }
  0xe1   :  { %v149_v22 = vpop.f32.mrf.mxu0 }
  0xe2   :  { %v150_v24 = vadd.f32 %v149_v22, %v99_v21 }
  0xe3   :  { %v554_v23 = vpop.f32.mrf.mxu0 }
  0xe4   :  { %v156_v28 = vmax.f32 %v150_v24, 0.0 }
  0xe5   :  { %v152_v25 = vpop.f32.mrf.mxu0 }
  0xe6   :  { %v153_v26 = vadd.f32 %v152_v25, %v99_v21 }
  0xe7   :  { %v555_v27 = vpop.f32.mrf.mxu0 }
  0xe8   :  { %v157_v29 = vmax.f32 %v153_v26, 0.0 }
  0xea   :  { %v158_v30 = vpack.c.bf16 %v157_v29, %v156_v28 }
  0xec   :  { %573 = vmatmul.mubr.bf16.vlgmr.msra.gmra.mxu1 %v158_v30 }
  0xed   :  { %612 = vmatprep.mubr.msk.bf16.mxu1 %vm703_vm0, %v702_v0  ;;  %597 = vmatpush3.bf16.msra.mxu1 %v640_v34 }
  0xee   :  { %598 = vmatprep.subr.bf16.mxu1 %v702_v0 }
  0xf1   :  { %599 = vmatpush3.bf16.msra.mxu1 %v641_v35 }
  0xf2   :  { %600 = vmatprep.subr.bf16.mxu1 %v702_v0 }
  0xf5   :  { %601 = vmatpush3.bf16.msra.mxu1 %v642_v36 }
  0xf6   :  { %602 = vmatprep.subr.bf16.mxu1 %v702_v0 }
  0xf9   :  { %603 = vmatpush3.bf16.msra.mxu1 %v643_v37 }
  0xfa   :  { %604 = vmatprep.subr.bf16.mxu1 %v702_v0 }
  0xfd   :  { %605 = vmatpush3.bf16.msra.mxu1 %v644_v38 }
  0xfe   :  { %606 = vmatprep.subr.bf16.mxu1 %v702_v0 }
 0x101   :  { %607 = vmatpush3.bf16.msra.mxu1 %v645_v50 }
 0x102   :  { %608 = vmatprep.subr.bf16.mxu1 %v702_v0 }
 0x105   :  { %609 = vmatpush3.bf16.msra.mxu1 %v646_v51 }
 0x106   :  { %610 = vmatprep.subr.bf16.mxu1 %v702_v0  ;;  %v354_v0 = vrot.slane %v95_v54, %v353_v3 }
 0x109   :  { %611 = vmatpush3.bf16.msra.mxu1 %v647_v52 }
 0x1ac   :  { %v245_v41 = vpop.f32.mrf.mxu1 }
 0x1ad   :  { %v246_v43 = vadd.f32 %v245_v41, %v162_v40 }
 0x1ae   :  { %v574_v42 = vpop.f32.mrf.mxu1 }
 0x1af   :  { %v252_v47 = vmax.f32 %v246_v43, 0.0 }
 0x1b0   :  { %v248_v44 = vpop.f32.mrf.mxu1 }
 0x1b1   :  { %v249_v45 = vadd.f32 %v248_v44, %v162_v40 }
 0x1b2   :  { %v575_v46 = vpop.f32.mrf.mxu1 }
 0x1b3   :  { %v253_v48 = vmax.f32 %v249_v45, 0.0 }
 0x1b5   :  { %v254_v49 = vpack.c.bf16 %v253_v48, %v252_v47 }
 0x1b7   :  { %593 = vmatmul.mubr.bf16.vlgmr.msra.gmra.mxu0 %v254_v49 }
 0x277   :  { %v341_v57 = vpop.f32.mrf.mxu0 }
 0x278   :  { %v342_v59 = vadd.f32 %v341_v57, %v258_v56 }
 0x279   :  { %v594_v58 = vpop.f32.mrf.mxu0 }
 0x27a   :  { %v348_v63 = vmax.f32 %v342_v59, 0.0 }
 0x27b   :  { %v344_v60 = vpop.f32.mrf.mxu0 }
 0x27c   :  { %v345_v61 = vadd.f32 %v344_v60, %v258_v56 }
 0x27d   :  { %v595_v62 = vpop.f32.mrf.mxu0 }
 0x27e   :  { %v349_v1 = vmax.f32 %v345_v61, 0.0 }
 0x280   :  { %v350_v2 = vpack.c.bf16 %v349_v1, %v348_v63 }
 0x282   :  { %613 = vmatmul.mubr.bf16.vlgmr.msra.gmra.mxu1 %v350_v2 }
 0x342   :  { %v437_v4 = vpop.f32.mrf.mxu1 }
 0x343   :  { %v438_v5 = vadd.f32 %v437_v4, %v354_v0 }
 0x344   :  { %v614_v6 = vpop.f32.mrf.mxu1 }
 0x345   :  { %v454_v7 = vsel %vm453_vm2, %v438_v5, -inf }
 0x346   :  { %v457_v8 = vrot.slane %v454_v7, 4  ;;  %v440_v9 = vpop.f32.mrf.mxu1 }
 0x347   :  { %v441_v35 = vadd.f32 %v440_v9, %v354_v0 }
 0x348   :  { %v458_v10 = vmax.f32 %v454_v7, %v457_v8  ;;  %v615_v11 = vpop.f32.mrf.mxu1 }
 0x34a   :  { %v459_v12 = vrot.slane %v458_v10, 2 }
 0x34c   :  { %v460_v13 = vmax.f32 %v458_v10, %v459_v12 }
 0x34e   :  { %v461_v14 = vrot.slane %v460_v13, 1 }
 0x350   :  { %v462_v15 = vmax.f32 %v460_v13, %v461_v14 }
 0x352   :  { %v463_v18 = vsub.f32 %v438_v5, %v462_v15  ;;  %v464_v19 = vsub.f32 -inf, %v462_v15 }
 0x354   :  { %v465_v20 = vmul.f32 1.442695, %v463_v18  ;;  %v467_v21 = vmul.f32 1.442695, %v464_v19 }
 0x356   :  { %648 = vpow2.f32 %v465_v20 }
 0x357   :  { %650 = vpow2.f32 %v467_v21 }
 0x363   :  { %v649_v17 = vpop.eup %648 }
 0x364   :  { %v651_v22 = vpop.eup %650  ;;  %v469_v23 = vsel %vm453_vm2, %v649_v17, 0.0 }
 0x365   :  { %v470_v24 = vsel %vm453_vm2, %v651_v22, 0.0 }
 0x366   :  { %v471_v25 = vadd.f32 %v470_v24, %v469_v23 }
 0x368   :  { %v472_v26 = vrot.slane %v471_v25, 4 }
 0x36a   :  { %v473_v27 = vadd.f32 %v472_v26, %v471_v25 }
 0x36c   :  { %v474_v28 = vrot.slane %v473_v27, 2 }
 0x36e   :  { %v475_v29 = vadd.f32 %v474_v28, %v473_v27 }
 0x370   :  { %v476_v30 = vrot.slane %v475_v29, 1 }
 0x372   :  { %v477_v31 = vadd.f32 %v476_v30, %v475_v29 }
 0x374   :  { %652 = vrcp.f32 %v477_v31 }
 0x381   :  { %v653_v33 = vpop.eup %652 }
 0x382   :  { %v479_v34 = vmul.f32 %v653_v33, %v649_v17  ;;  %v480_v36 = vmul.f32 %v653_v33, %v651_v22 }
 0x384   :  { %v484_v37 = vsel %vm483_vm5, %v479_v34, %v438_v5  ;;  %v485_v38 = vsel %vm483_vm5, %v480_v36, %v441_v35 }
 0x385   :  { %486 = vst.msk [vmem:[%s779_s2] sm:$0xff] %vm453_vm2, %v484_v37  ;;  %487 = vst.msk [vmem:[%s779_s2 + $0x8] sm:$0xff] %vm453_vm2, %v485_v38 }
 0x386   :  { %492 = vsyncpa [#allocation3], 1 }
 0x387   :  { %493 = vsyncpa [#allocation5], 1 }

</bundles_post_ra>
